<compile_context>
chip_gen: v6e
topology: v6e:2x2x1
jax: 0.10.0
libtpu: 0.0.40
codegen_flags: <defaults>
</compile_context>

<pallas_src>
import jax
import jax.numpy as jnp
from jax.experimental import pallas as pl
from jax.experimental.pallas import tpu as pltpu


def _round_up(x, m):
    return ((x + m - 1) // m) * m


def _emb_to_seq_kernel(x_ref, w1_ref, b1_ref, w2_ref, b2_ref, o_ref):
    # x_ref : (TM, D)       w1_ref : (D, H)     b1_ref : (1, H)
    # w2_ref: (H, O_pad)    b2_ref : (1, O_pad) o_ref  : (TM, O_pad)
    x = x_ref[...]
    h = jnp.dot(x, w1_ref[...], preferred_element_type=jnp.float32) + b1_ref[...]
    h = jnp.maximum(h, 0.0)                      # ReLU
    # dropout == identity (eval mode)
    y = jnp.dot(h, w2_ref[...], preferred_element_type=jnp.float32) + b2_ref[...]
    o_ref[...] = y.astype(o_ref.dtype)


def emb_to_seq(seq, w1, b1, w2, b2, *, tm=2048):
    """seq: (B, S, D) float32 -> (B, S, 123) float32.

    w1: (D, 256), b1: (1, 256), w2: (256, 123), b2: (1, 123)
    (weights stored (in_features, out_features), i.e. transposed vs PyTorch).
    """
    B, S, D = seq.shape
    M = B * S
    H = w1.shape[1]          # 256
    O = w2.shape[1]          # 123
    O_pad = _round_up(O, 128)  # 128: lane-dense output stores + clean MXU N

    # Zero-pad the second linear to the padded output width.
    w2p = jnp.pad(w2, ((0, 0), (0, O_pad - O)))
    b2p = jnp.pad(b2, ((0, 0), (0, O_pad - O)))

    # Flatten and pad rows so the tile evenly divides M (tile multiple of 8).
    x2d = seq.reshape(M, D)
    TM = min(tm, _round_up(max(M, 1), 8))
    M_pad = _round_up(M, TM)
    if M_pad != M:
        x2d = jnp.pad(x2d, ((0, M_pad - M), (0, 0)))

    grid = (M_pad // TM,)

    cost = pl.CostEstimate(
        flops=2 * M_pad * (D * H + H * O_pad),
        transcendentals=0,
        bytes_accessed=4 * (M_pad * D + M_pad * O_pad
                            + D * H + H + H * O_pad + O_pad),
    )

    out2d = pl.pallas_call(
        _emb_to_seq_kernel,
        out_shape=jax.ShapeDtypeStruct((M_pad, O_pad), jnp.float32),
        grid_spec=pltpu.PrefetchScalarGridSpec(
            num_scalar_prefetch=0,
            grid=grid,
            in_specs=[
                pl.BlockSpec((TM, D), lambda i: (i, 0)),   # streamed row tiles
                pl.BlockSpec((D, H), lambda i: (0, 0)),    # resident weights
                pl.BlockSpec((1, H), lambda i: (0, 0)),
                pl.BlockSpec((H, O_pad), lambda i: (0, 0)),
                pl.BlockSpec((1, O_pad), lambda i: (0, 0)),
            ],
            out_specs=pl.BlockSpec((TM, O_pad), lambda i: (i, 0)),
        ),
        compiler_params=pltpu.CompilerParams(
            dimension_semantics=("parallel",)),
        cost_estimate=cost,
    )(x2d, w1, b1, w2p, b2p)

    return out2d[:M, :O].reshape(B, S, O)


def _ref_forward(seq, w1, b1, w2, b2):
    h = jnp.maximum(seq @ w1 + b1, 0.0)
    return h @ w2 + b2


if __name__ == "__main__":
    key = jax.random.PRNGKey(0)
    B, S, D = 2, 8, 32            # batch, seq_len, input_dim
    H, O = 256, 123               # fc_1 out, fc_2 out (fixed by the module)

    k_x, k_w1, k_b1, k_w2, k_b2 = jax.random.split(key, 5)
    seq = jax.random.normal(k_x, (B, S, D), dtype=jnp.float32)

    # Deterministic PyTorch-Linear-style init: U(-1/sqrt(fan_in), 1/sqrt(fan_in))
    lim1 = 1.0 / (D ** 0.5)
    lim2 = 1.0 / (H ** 0.5)
    w1 = jax.random.uniform(k_w1, (D, H), jnp.float32, -lim1, lim1)
    b1 = jax.random.uniform(k_b1, (1, H), jnp.float32, -lim1, lim1)
    w2 = jax.random.uniform(k_w2, (H, O), jnp.float32, -lim2, lim2)
    b2 = jax.random.uniform(k_b2, (1, O), jnp.float32, -lim2, lim2)

    out = emb_to_seq(seq, w1, b1, w2, b2)
    jax.block_until_ready(out)

    ref = _ref_forward(seq, w1, b1[0], w2, b2[0])
    assert out.shape == (B, S, O), out.shape
    assert jnp.allclose(out, ref, atol=1e-4, rtol=1e-4), float(
        jnp.max(jnp.abs(out - ref)))

    print("KERNEL_OK")
</pallas_src>

<mosaic_0001>
module attributes {stable_mosaic.version = 11 : i64} {
  func.func @_emb_to_seq_kernel(%arg0: i32, %arg1: memref<16x32xf32, #tpu.memory_space<vmem>>, %arg2: memref<32x256xf32, #tpu.memory_space<vmem>>, %arg3: memref<1x256xf32, #tpu.memory_space<vmem>>, %arg4: memref<256x128xf32, #tpu.memory_space<vmem>>, %arg5: memref<1x128xf32, #tpu.memory_space<vmem>>, %arg6: memref<16x128xf32, #tpu.memory_space<vmem>>) attributes {dimension_semantics = [#tpu.dimension_semantics<parallel>], iteration_bounds = array<i64: 1>, scalar_prefetch = 0 : i64, scratch_operands = 0 : i64, tpu.core_type = #tpu.core_type<tc>, window_params = [{transform_indices = @transform_0, window_bounds = array<i64: 16, 32>}, {pipeline_mode = #tpu.pipeline_mode<synchronous>, transform_indices = @transform_1, window_bounds = array<i64: 32, 256>}, {pipeline_mode = #tpu.pipeline_mode<synchronous>, transform_indices = @transform_2, window_bounds = array<i64: 1, 256>}, {pipeline_mode = #tpu.pipeline_mode<synchronous>, transform_indices = @transform_3, window_bounds = array<i64: 256, 128>}, {pipeline_mode = #tpu.pipeline_mode<synchronous>, transform_indices = @transform_4, window_bounds = array<i64: 1, 128>}, {transform_indices = @transform_5, window_bounds = array<i64: 16, 128>}]} {
    %c0 = arith.constant 0 : index
    %c0_0 = arith.constant 0 : index
    %0 = vector.load %arg1[%c0, %c0_0] : memref<16x32xf32, #tpu.memory_space<vmem>>, vector<16x32xf32>
    %c0_1 = arith.constant 0 : index
    %c0_2 = arith.constant 0 : index
    %1 = vector.load %arg2[%c0_1, %c0_2] : memref<32x256xf32, #tpu.memory_space<vmem>>, vector<32x256xf32>
    %cst = arith.constant dense<0.000000e+00> : vector<16x256xf32>
    %2 = tpu.matmul %0, %1, %cst {dimension_numbers = #tpu.dot_dimension_numbers<[1], [0], [0], [1], [0, 0, 1, 1], [], []>} : vector<16x32xf32>, vector<32x256xf32>, vector<16x256xf32> -> vector<16x256xf32>
    %c0_3 = arith.constant 0 : index
    %c0_4 = arith.constant 0 : index
    %3 = vector.load %arg3[%c0_3, %c0_4] : memref<1x256xf32, #tpu.memory_space<vmem>>, vector<1x256xf32>
    %4 = vector.broadcast %3 : vector<1x256xf32> to vector<16x256xf32>
    %5 = arith.addf %2, %4 : vector<16x256xf32>
    %cst_5 = arith.constant 0.000000e+00 : f32
    %6 = vector.broadcast %cst_5 : f32 to vector<16x256xf32>
    %7 = arith.maximumf %5, %6 : vector<16x256xf32>
    %c0_6 = arith.constant 0 : index
    %c0_7 = arith.constant 0 : index
    %8 = vector.load %arg4[%c0_6, %c0_7] : memref<256x128xf32, #tpu.memory_space<vmem>>, vector<256x128xf32>
    %cst_8 = arith.constant dense<0.000000e+00> : vector<16x128xf32>
    %9 = tpu.matmul %7, %8, %cst_8 {dimension_numbers = #tpu.dot_dimension_numbers<[1], [0], [0], [1], [0, 0, 1, 1], [], []>} : vector<16x256xf32>, vector<256x128xf32>, vector<16x128xf32> -> vector<16x128xf32>
    %c0_9 = arith.constant 0 : index
    %c0_10 = arith.constant 0 : index
    %10 = vector.load %arg5[%c0_9, %c0_10] : memref<1x128xf32, #tpu.memory_space<vmem>>, vector<1x128xf32>
    %11 = vector.broadcast %10 : vector<1x128xf32> to vector<16x128xf32>
    %12 = arith.addf %9, %11 : vector<16x128xf32>
    %c0_11 = arith.constant 0 : index
    %c0_12 = arith.constant 0 : index
    %13 = vector.load %arg6[%c0_11, %c0_12] : memref<16x128xf32, #tpu.memory_space<vmem>>, vector<16x128xf32>
    tpu.vector_store %arg6[%c0_11, %c0_12], %12 {strides = array<i32>} : memref<16x128xf32, #tpu.memory_space<vmem>>, vector<16x128xf32>,
    return
  }
  func.func @transform_0(%arg0: i32) -> (i32, i32) {
    %c0_i32 = arith.constant 0 : i32
    %c0_i32_0 = arith.constant 0 : i32
    return %arg0, %c0_i32 : i32, i32
  }
  func.func @transform_1(%arg0: i32) -> (i32, i32) {
    %c0_i32 = arith.constant 0 : i32
    %c0_i32_0 = arith.constant 0 : i32
    %c0_i32_1 = arith.constant 0 : i32
    return %c0_i32, %c0_i32_0 : i32, i32
  }
  func.func @transform_2(%arg0: i32) -> (i32, i32) {
    %c0_i32 = arith.constant 0 : i32
    %c0_i32_0 = arith.constant 0 : i32
    %c0_i32_1 = arith.constant 0 : i32
    return %c0_i32, %c0_i32_0 : i32, i32
  }
  func.func @transform_3(%arg0: i32) -> (i32, i32) {
    %c0_i32 = arith.constant 0 : i32
    %c0_i32_0 = arith.constant 0 : i32
    %c0_i32_1 = arith.constant 0 : i32
    return %c0_i32, %c0_i32_0 : i32, i32
  }
  func.func @transform_4(%arg0: i32) -> (i32, i32) {
    %c0_i32 = arith.constant 0 : i32
    %c0_i32_0 = arith.constant 0 : i32
    %c0_i32_1 = arith.constant 0 : i32
    return %c0_i32, %c0_i32_0 : i32, i32
  }
  func.func @transform_5(%arg0: i32) -> (i32, i32) {
    %c0_i32 = arith.constant 0 : i32
    %c0_i32_0 = arith.constant 0 : i32
    return %arg0, %c0_i32 : i32, i32
  }
}

</mosaic_0001>

<bundles_post_ra>
// kernel: tpu_custom_call.1
= control target key start
LH: loop header
LB: loop body
LE: loop exit
PB: predicated region body
PF: predicated region fallthrough
CT: control target
= control target key end

     0   :  { %10 = vsyncpa [#allocation3], 0  ;;  %s510_s0 = inlined_call_operand.hbm [shape: f32[16,32], index: 0, kind: input, shape index: {}]   ;;  %s511_s1 = inlined_call_operand.hbm [shape: f32[32,256], index: 1, kind: input, shape index: {}]   ;;  %s512_s2 = inlined_call_operand.vmem [shape: f32[1,256], index: 2, kind: input, shape index: {}]   ;;  %s513_s3 = inlined_call_operand.hbm [shape: f32[256,128], index: 3, kind: input, shape index: {}]   ;;  %s514_s4 = inlined_call_operand.vmem [shape: f32[1,128], index: 4, kind: input, shape index: {}]   ;;  %s515_s5 = inlined_call_operand.hbm [shape: f32[16,128], index: 5, kind: output, shape index: {}]  }
   0x1   :  { %11 = vsyncpa [#allocation6], 0 }
   0x2   :  { %12 = vsyncpa [#allocation4], 0  ;;  %s442_s18 = smov [#allocation5]  }
   0x3   :  { %s30_s19 = sshll.u32 %s442_s18, 4  ;;  %s31_s19 = int_to_ptr.vmem [resolvable:$true] %s30_s19 }
   0x4   :  { %s364_s20 = scalar_lea.vmem %s31_s19, 1024  ;;  %p369_p1 = scmp.lt.s32.totalorder %s31_s19, %s31_s19 }
   0x5   :  { %p365_p0 = scmp.ne.s32.totalorder %s31_s19, %s364_s20  ;;  %p370_p2 = scmp.lt.s32.totalorder %s364_s20, %s364_s20 }
   0x7   :  { %p371_p3 = por %p370_p2, %p369_p1 }
   0x9   :  { %p372_p4 = pnand %p371_p3, %p365_p0 }
   0xb   :  { %375 = shalt.err (!%p372_p4)
}
   0xc   :  { %s443_s21 = smov 256   ;;  %s444_s22 = smov 16  }
   0xd   :  { %36 = dma.hbm_to_vmem [thread:$0]  %s511_s1, 1024, %s31_s19, [#allocation6], %s443_s21, %s443_s21, %s444_s22  }
   0xe   :  { %s445_s25 = smov [#allocation2]  }
   0xf   :  { %s18_s26 = sshll.u32 %s445_s25, 4  ;;  %s19_s26 = int_to_ptr.vmem [resolvable:$true] %s18_s26 }
  0x10   :  { %s384_s27 = scalar_lea.vmem %s19_s26, 256  ;;  %p389_p6 = scmp.lt.s32.totalorder %s19_s26, %s19_s26 }
  0x11   :  { %p385_p5 = scmp.ne.s32.totalorder %s19_s26, %s384_s27  ;;  %p390_p7 = scmp.lt.s32.totalorder %s384_s27, %s384_s27 }
  0x13   :  { %p391_p8 = por %p390_p7, %p389_p6 }
  0x15   :  { %p392_p9 = pnand %p391_p8, %p385_p5 }
  0x17   :  { %395 = shalt.err (!%p392_p9)
}
  0x18   :  { %s446_s28 = smov 128   ;;  %s447_s29 = smov 8  }
  0x19   :  { %24 = dma.hbm_to_vmem [thread:$0]  %s510_s0, 256, %s19_s26, [#allocation3], %s446_s28, %s446_s28, %s447_s29  }
  0x1a   :  { %s448_s1 = smov [#allocation7]  }
  0x1b   :  { %s44_s7 = sshll.u32 %s448_s1, 4  ;;  %s45_s7 = int_to_ptr.vmem [resolvable:$true] %s44_s7 }
  0x1c   :  { %s404_s8 = scalar_lea.vmem %s45_s7, 4096  ;;  %p409_p11 = scmp.lt.s32.totalorder %s45_s7, %s45_s7 }
  0x1d   :  { %p405_p10 = scmp.ne.s32.totalorder %s45_s7, %s404_s8  ;;  %p410_p12 = scmp.lt.s32.totalorder %s404_s8, %s404_s8 }
  0x1f   :  { %p411_p13 = por %p410_p12, %p409_p11 }
  0x21   :  { %p412_p0 = pnand %p411_p13, %p405_p10 }
  0x23   :  { %415 = shalt.err (!%p412_p0)
}
  0x24   :  { %50 = dma.hbm_to_vmem [thread:$0]  %s513_s3, 4096, %s45_s7, [#allocation6], %s446_s28, %s446_s28, %s447_s29  }
  0x25   :  { %436 = dma.done.wait [#allocation3], 256  }
  0x26   :  { %437 = vsyncadd [#allocation3], 4294967040 }
  0x27   :  { %438 = dma.done.wait [#allocation6], 5120  }
  0x28   :  { %439 = vsyncadd [#allocation6], 4294962176  ;;  %v449_v0 = vmov 0.0   ;;  %v71_v1 = vld [vmem:[#allocation5 + $0x38] sm:$0xff]  ;;  %v70_v2 = vld [vmem:[#allocation5 + $0x30] sm:$0xff]  ;;  %vm84_vm0 = vcmask 261120   ;;  %v74_v43 = vlaneseq }
  0x29   :  { %155 = vmatprep.mubr.f32.mxu0 %v449_v0  ;;  %v69_v3 = vld [vmem:[#allocation5 + $0x28] sm:$0xff]  ;;  %115 = vmatprep.subr.mxu0 %v71_v1  ;;  %v68_v4 = vld [vmem:[#allocation5 + $0x20] sm:$0xff]  ;;  %v67_v5 = vld [vmem:[#allocation5 + $0x18] sm:$0xff]  ;;  %s450_s12 = smov [#allocation8]  }
  0x2a   :  { %116 = vmatpush1.msra.mxu0 %v70_v2  ;;  %v66_v6 = vld [vmem:[#allocation5 + $0x10] sm:$0xff]  ;;  %v203_v7 = vld [vmem:[#allocation7 + $0xf8] sm:$0xff]  ;;  %v65_v9 = vld [vmem:[#allocation5 + $0x8] sm:$0xff]  ;;  %v75_v44 = vshrl.u32 %v74_v43, 7  ;;  %s293_s13 = sshll.u32 %s450_s12, 4  ;;  %s294_s13 = int_to_ptr.vmem [resolvable:$true] %s293_s13 }
  0x2b   :  { %117 = vmatprep.subr.mxu0 %v69_v3  ;;  %v187_v8 = vld [vmem:[#allocation7 + $0x78] sm:$0xff]  ;;  %309 = vmatprep.subr.mxu1 %v203_v7  ;;  %v202_v10 = vld [vmem:[#allocation7 + $0xf0] sm:$0xff]  ;;  %v64_v12 = vld [vmem:[#allocation5] sm:$0xff]  ;;  %s416_s14 = scalar_lea.vmem %s294_s13, 256  ;;  %p421_p2 = scmp.lt.s32.totalorder %s294_s13, %s294_s13 }
  0x2c   :  { %118 = vmatpush1.msra.mxu0 %v68_v4  ;;  %v186_v11 = vld [vmem:[#allocation7 + $0x70] sm:$0xff]  ;;  %310 = vmatpush3.msra.mxu1 %v187_v8  ;;  %v201_v13 = vld [vmem:[#allocation7 + $0xe8] sm:$0xff]  ;;  %v200_v16 = vld [vmem:[#allocation7 + $0xe0] sm:$0xff]  ;;  %v76_v45 = vsub.s32 0, %v75_v44  ;;  %v80_v47 = vsub.s32 1, %v75_v44  ;;  %p417_p1 = scmp.ne.s32.totalorder %s294_s13, %s416_s14  ;;  %p422_p3 = scmp.lt.s32.totalorder %s416_s14, %s416_s14 }
  0x2d   :  { %119 = vmatprep.subr.mxu0 %v67_v5  ;;  %v62_v14 = vld [vmem:[#allocation2] sm:$0xff]  ;;  %311 = vmatprep.subr.mxu1 %v202_v10  ;;  %v185_v15 = vld [vmem:[#allocation7 + $0x68] sm:$0xff]  ;;  %v184_v17 = vld [vmem:[#allocation7 + $0x60] sm:$0xff] }
  0x2e   :  { %120 = vmatpush1.msra.mxu0 %v66_v6  ;;  %312 = vmatpush3.msra.mxu1 %v186_v11  ;;  %v199_v18 = vld [vmem:[#allocation7 + $0xd8] sm:$0xff]  ;;  %v198_v21 = vld [vmem:[#allocation7 + $0xd0] sm:$0xff]  ;;  %v197_v23 = vld [vmem:[#allocation7 + $0xc8] sm:$0xff]  ;;  %p423_p4 = por %p422_p3, %p421_p2 }
  0x2f   :  { %121 = vmatprep.subr.mxu0 %v65_v9  ;;  %313 = vmatprep.subr.mxu1 %v201_v13  ;;  %v63_v19 = vld [vmem:[#allocation2 + $0x8] sm:$0xff]  ;;  %v182_v22 = vld [vmem:[#allocation7 + $0x50] sm:$0xff]  ;;  %v181_v24 = vld [vmem:[#allocation7 + $0x48] sm:$0xff] }
  0x30   :  { %122 = vmatpush1.msra.mxu0 %v64_v12  ;;  %314 = vmatpush3.msra.mxu1 %v185_v15  ;;  %v183_v20 = vld [vmem:[#allocation7 + $0x58] sm:$0xff]  ;;  %v196_v25 = vld [vmem:[#allocation7 + $0xc0] sm:$0xff]  ;;  %v194_v29 = vld [vmem:[#allocation7 + $0xb0] sm:$0xff]  ;;  %p424_p5 = pnand %p423_p4, %p417_p1 }
  0x31   :  { %306 = vmatmul.mubr.msk.f32.vlgmr.msra.gmra.mxu0 %vm84_vm0, %v62_v14  ;;  %315 = vmatprep.subr.mxu1 %v200_v16  ;;  %v180_v26 = vld [vmem:[#allocation7 + $0x40] sm:$0xff]  ;;  %v195_v27 = vld [vmem:[#allocation7 + $0xb8] sm:$0xff]  ;;  %v178_v30 = vld [vmem:[#allocation7 + $0x30] sm:$0xff] }
  0x32   :  { %161 = vmatprep.mubr.f32.mxu0 %v449_v0  ;;  %316 = vmatpush3.msra.mxu1 %v184_v17  ;;  %v179_v28 = vld [vmem:[#allocation7 + $0x38] sm:$0xff]  ;;  %v193_v31 = vld [vmem:[#allocation7 + $0xa8] sm:$0xff]  ;;  %v192_v33 = vld [vmem:[#allocation7 + $0xa0] sm:$0xff] }
  0x33   :  { %317 = vmatprep.subr.mxu1 %v199_v18  ;;  %v177_v32 = vld [vmem:[#allocation7 + $0x28] sm:$0xff]  ;;  %v176_v34 = vld [vmem:[#allocation7 + $0x20] sm:$0xff]  ;;  %v191_v35 = vld [vmem:[#allocation7 + $0x98] sm:$0xff] }
  0x34   :  { %318 = vmatpush3.msra.mxu1 %v183_v20  ;;  %v175_v36 = vld [vmem:[#allocation7 + $0x18] sm:$0xff]  ;;  %v190_v37 = vld [vmem:[#allocation7 + $0x90] sm:$0xff]  ;;  %v189_v39 = vld [vmem:[#allocation7 + $0x88] sm:$0xff] }
  0x35   :  { %307 = vmatmul.mubr.msk.f32.gmra.mxu0 %vm84_vm0, %v63_v19  ;;  %319 = vmatprep.subr.mxu1 %v198_v21  ;;  %v174_v38 = vld [vmem:[#allocation7 + $0x10] sm:$0xff]  ;;  %v173_v40 = vld [vmem:[#allocation7 + $0x8] sm:$0xff]  ;;  %v188_v41 = vld [vmem:[#allocation7 + $0x80] sm:$0xff] }
  0x36   :  { %320 = vmatpush3.msra.mxu1 %v182_v22  ;;  %v172_v42 = vld [vmem:[#allocation7] sm:$0xff]  ;;  %v72_v46 = vld [vmem:[%s512_s2] sm:$0x3] }
  0x37   :  { %321 = vmatprep.subr.mxu1 %v197_v23  ;;  %v77_v48 = vrot.slane %v72_v46, %v76_v45  ;;  %v81_v49 = vrot.slane %v72_v46, %v80_v47  ;;  %v308_v63 = vld [vmem:[%s514_s4] ss:$0 sm:$0xff] }
  0x38   :  { %322 = vmatpush3.msra.mxu1 %v181_v24 }
  0x39   :  { %323 = vmatprep.subr.mxu1 %v196_v25 }
  0x3a   :  { %324 = vmatpush3.msra.mxu1 %v180_v26 }
  0x3b   :  { %325 = vmatprep.subr.mxu1 %v195_v27 }
  0x3c   :  { %326 = vmatpush3.msra.mxu1 %v179_v28 }
  0x3d   :  { %327 = vmatprep.subr.mxu1 %v194_v29 }
  0x3e   :  { %328 = vmatpush3.msra.mxu1 %v178_v30 }
  0x3f   :  { %329 = vmatprep.subr.mxu1 %v193_v31 }
  0x40   :  { %330 = vmatpush3.msra.mxu1 %v177_v32 }
  0x41   :  { %331 = vmatprep.subr.mxu1 %v192_v33 }
  0x42   :  { %332 = vmatpush3.msra.mxu1 %v176_v34 }
  0x43   :  { %333 = vmatprep.subr.mxu1 %v191_v35 }
  0x44   :  { %334 = vmatpush3.msra.mxu1 %v175_v36 }
  0x45   :  { %335 = vmatprep.subr.mxu1 %v190_v37 }
  0x46   :  { %336 = vmatpush3.msra.mxu1 %v174_v38 }
  0x47   :  { %337 = vmatprep.subr.mxu1 %v189_v39 }
  0x48   :  { %338 = vmatpush3.msra.mxu1 %v173_v40 }
  0x49   :  { %339 = vmatprep.subr.mxu1 %v188_v41 }
  0x4a   :  { %340 = vmatpush3.msra.mxu1 %v172_v42 }
  0xf1   :  { %v157_v50 = vpop.f32.mrf.mxu0 }
  0xf2   :  { %v158_v51 = vadd.f32 %v157_v50, %v77_v48 }
  0xf3   :  { %v159_v52 = vpop.f32.mrf.mxu0 }
  0xf4   :  { %v160_v53 = vadd.f32 %v159_v52, %v81_v49  ;;  %v168_v56 = vmax.f32 %v158_v51, 0.0 }
  0xf5   :  { %v163_v54 = vpop.f32.mrf.mxu0 }
  0xf6   :  { %v169_v55 = vmax.f32 %v160_v53, 0.0  ;;  %v164_v57 = vadd.f32 %v163_v54, %v77_v48 }
  0xf7   :  { %v165_v58 = vpop.f32.mrf.mxu0 }
  0xf8   :  { %v166_v59 = vadd.f32 %v165_v58, %v81_v49  ;;  %275 = vmatprep.mubr.f32.mxu1 %v169_v55  ;;  %v170_v61 = vmax.f32 %v164_v57, 0.0 }
  0xf9   :  { %276 = vmatmul.mubr.f32.vlgmr.msra.gmra.mxu1 %v168_v56 }
  0xfa   :  { %v171_v60 = vmax.f32 %v166_v59, 0.0 }
  0xfc   :  { %280 = vmatprep.mubr.f32.mxu1 %v171_v60 }
  0xfd   :  { %281 = vmatmul.mubr.f32.gmra.mxu1 %v170_v61 }
 0x1b9   :  { %v341_v62 = vpop.f32.mrf.mxu1 }
 0x1bb   :  { %v342_v0 = vpop.f32.mrf.mxu1 }
 0x1bc   :  { %v343_v1 = vadd.f32 %v342_v0, %v341_v62 }
 0x1bd   :  { %v344_v2 = vpop.f32.mrf.mxu1 }
 0x1be   :  { %v278_v3 = vadd.f32 %v343_v1, %v308_v63 }
 0x1bf   :  { %v345_v4 = vpop.f32.mrf.mxu1 }
 0x1c0   :  { %286 = vst [vmem:[#allocation8] sm:$0xff] %v278_v3  ;;  %v346_v5 = vadd.f32 %v345_v4, %v344_v2 }
 0x1c2   :  { %v283_v6 = vadd.f32 %v346_v5, %v308_v63 }
 0x1c4   :  { %287 = vst [vmem:[#allocation8 + $0x8] sm:$0xff] %v283_v6 }
 0x1c5   :  { %427 = shalt.err (!%p424_p5)
}
 0x1c6   :  { %299 = dma.vmem_to_hbm [thread:$0]  %s294_s13, 256, %s515_s5, [#allocation4], %s446_s28, %s446_s28, %s447_s29  }
 0x1c7   :  { %440 = dma.done.wait [#allocation4], 256  }
 0x1c8   :  { %441 = vsyncadd [#allocation4], 4294967040 }
 0x1c9   :  { %303 = vsyncpa [#allocation3], 1 }
 0x1ca   :  { %304 = vsyncpa [#allocation6], 1 }
 0x1cb   :  { %305 = vsyncpa [#allocation4], 1 }

</bundles_post_ra>
